<compile_context>
chip_gen: v7x
topology: tpu7x:2x2x1
jax: 0.10.0
libtpu: 0.0.40
codegen_flags: <defaults>
</compile_context>

<pallas_src>
import functools

import jax
import jax.numpy as jnp
from jax.experimental import pallas as pl
from jax.experimental.pallas import tpu as pltpu


# ----------------------------- config ---------------------------------------
PLAIN = 16
KEY = 16
HIDDEN = 32
DEPTH = 3            # 1 input layer + (DEPTH-1) residual layers + 1 output layer
CIPHER = 16
BATCH = 16
LANE = 128           # TPU lane width
THROUGHPUT_MIN_B = 2 * LANE   # need >= 2 lane-dense tiles for megacore
MAX_TILE_B = 8192    # per-step batch tile cap for the throughput path


# ----------------------------- kernels ---------------------------------------
def alice_latency_kernel(p_ref, k_ref, w_in_p_ref, w_in_k_ref, b_in_ref,
                         w_mlp_ref, b_mlp_ref, w_out_ref, b_out_ref, o_ref,
                         *, n_res, matmul_dtype):
    """Small-batch path: batch on sublanes, whole batch in one grid step.

    p_ref: (B, PLAIN)  k_ref: (B, KEY)
    w_in_p_ref: (PLAIN, H)  w_in_k_ref: (KEY, H)  b_in_ref: (1, H)
    w_mlp_ref: (n_res, H, H)  b_mlp_ref: (n_res, 1, H)
    w_out_ref: (H, CIPHER)  b_out_ref: (1, CIPHER)  o_ref: (B, CIPHER)
    """
    cast = lambda x: x.astype(matmul_dtype)

    # input layer (concat folded into two dots) + relu
    h = jnp.dot(cast(p_ref[...]), cast(w_in_p_ref[...]),
                preferred_element_type=jnp.float32)
    h = h + jnp.dot(cast(k_ref[...]), cast(w_in_k_ref[...]),
                    preferred_element_type=jnp.float32)
    h = jnp.maximum(h + b_in_ref[...], 0.0)

    # residual MLP layers: relu(h + (h @ W_l + b_l)), statically unrolled
    for layer in range(n_res):
        y = jnp.dot(cast(h), cast(w_mlp_ref[layer]),
                    preferred_element_type=jnp.float32) + b_mlp_ref[layer]
        h = jnp.maximum(h + y, 0.0)

    # output layer + tanh, stored directly at (B, CIPHER) (no padding, no slice)
    out = jnp.dot(cast(h), cast(w_out_ref[...]),
                  preferred_element_type=jnp.float32) + b_out_ref[...]
    o_ref[...] = jnp.tanh(out).astype(o_ref.dtype)


def alice_throughput_kernel(pT_ref, kT_ref, w_in_pT_ref, w_in_kT_ref, b_inT_ref,
                            w_mlpT_ref, b_mlpT_ref, w_outT_ref, b_outT_ref,
                            oT_ref, *, n_res, matmul_dtype):
    """Large-batch path: batch on the lane axis (transposed layout).

    pT_ref: (PLAIN, tile_b)  kT_ref: (KEY, tile_b)
    w_in_pT_ref: (H, PLAIN)  w_in_kT_ref: (H, KEY)  b_inT_ref: (H, 1)
    w_mlpT_ref: (n_res, H, H)  b_mlpT_ref: (n_res, H, 1)
    w_outT_ref: (CIPHER, H)  b_outT_ref: (CIPHER, 1)  oT_ref: (CIPHER, tile_b)
    """
    cast = lambda x: x.astype(matmul_dtype)

    # input layer: h^T = W_p^T @ p^T + W_k^T @ k^T + b  (lane-dense activations)
    h = jnp.dot(cast(w_in_pT_ref[...]), cast(pT_ref[...]),
                preferred_element_type=jnp.float32)
    h = h + jnp.dot(cast(w_in_kT_ref[...]), cast(kT_ref[...]),
                    preferred_element_type=jnp.float32)
    h = jnp.maximum(h + b_inT_ref[...], 0.0)

    # residual MLP layers: h = relu(h + W_l^T @ h + b_l)
    for layer in range(n_res):
        y = jnp.dot(cast(w_mlpT_ref[layer]), cast(h),
                    preferred_element_type=jnp.float32) + b_mlpT_ref[layer]
        h = jnp.maximum(h + y, 0.0)

    # output layer + tanh; exact-size lane-dense unmasked store
    out = jnp.dot(cast(w_outT_ref[...]), cast(h),
                  preferred_element_type=jnp.float32) + b_outT_ref[...]
    oT_ref[...] = jnp.tanh(out).astype(oT_ref.dtype)


# ----------------------------- param packing ---------------------------------
def prepare_params(params, plain=PLAIN):
    """One-time packing for both layouts.

    Latency layout: input weight split into p/k halves (kernel never needs a
    concatenated input). Throughput layout: all weights/biases pre-transposed
    so the kernel computes W^T @ x^T with batch on the lane axis.
    """
    w_in, b_in, w_mlp, b_mlp, w_out, b_out = params
    return {
        # latency (batch-on-sublanes) layout
        "w_in_p": w_in[:plain], "w_in_k": w_in[plain:], "b_in": b_in,
        "w_mlp": w_mlp, "b_mlp": b_mlp, "w_out": w_out, "b_out": b_out,
        # throughput (batch-on-lanes, transposed) layout
        "w_in_pT": w_in[:plain].T, "w_in_kT": w_in[plain:].T,
        "b_inT": b_in.T,
        "w_mlpT": jnp.transpose(w_mlp, (0, 2, 1)),
        "b_mlpT": jnp.transpose(b_mlp, (0, 2, 1)),
        "w_outT": w_out.T, "b_outT": b_out.T,
    }


# ----------------------------- wrappers ---------------------------------------
def _alice_latency(p, k, packed, matmul_dtype):
    B, plain = p.shape
    key_dim = k.shape[1]
    hid = packed["w_in_p"].shape[1]
    cip = packed["w_out"].shape[1]
    n_res = packed["w_mlp"].shape[0]

    kernel = functools.partial(alice_latency_kernel, n_res=n_res,
                               matmul_dtype=matmul_dtype)
    return pl.pallas_call(
        kernel,
        out_shape=jax.ShapeDtypeStruct((B, cip), jnp.float32),
        grid_spec=pltpu.PrefetchScalarGridSpec(
            num_scalar_prefetch=0,
            grid=(1,),
            in_specs=[
                pl.BlockSpec((B, plain), lambda i: (0, 0)),               # p
                pl.BlockSpec((B, key_dim), lambda i: (0, 0)),             # k
                pl.BlockSpec((plain, hid), lambda i: (0, 0)),             # w_in_p
                pl.BlockSpec((key_dim, hid), lambda i: (0, 0)),           # w_in_k
                pl.BlockSpec((1, hid), lambda i: (0, 0)),                 # b_in
                pl.BlockSpec((n_res, hid, hid), lambda i: (0, 0, 0)),     # w_mlp
                pl.BlockSpec((n_res, 1, hid), lambda i: (0, 0, 0)),       # b_mlp
                pl.BlockSpec((hid, cip), lambda i: (0, 0)),               # w_out
                pl.BlockSpec((1, cip), lambda i: (0, 0)),                 # b_out
            ],
            out_specs=pl.BlockSpec((B, cip), lambda i: (0, 0)),
        ),
        compiler_params=pltpu.CompilerParams(
            dimension_semantics=("parallel",)),
    )(p, k, packed["w_in_p"], packed["w_in_k"], packed["b_in"],
      packed["w_mlp"], packed["b_mlp"], packed["w_out"], packed["b_out"])


def _alice_throughput(p, k, packed, tile_b, matmul_dtype):
    B, plain = p.shape
    key_dim = k.shape[1]
    hid = packed["w_in_pT"].shape[0]
    cip = packed["w_outT"].shape[0]
    n_res = packed["w_mlpT"].shape[0]

    pT = p.T   # one-time layout change in the wrapper (batch -> lanes)
    kT = k.T
    grid = (B // tile_b,)

    kernel = functools.partial(alice_throughput_kernel, n_res=n_res,
                               matmul_dtype=matmul_dtype)
    outT = pl.pallas_call(
        kernel,
        out_shape=jax.ShapeDtypeStruct((cip, B), jnp.float32),
        grid_spec=pltpu.PrefetchScalarGridSpec(
            num_scalar_prefetch=0,
            grid=grid,
            in_specs=[
                pl.BlockSpec((plain, tile_b), lambda i: (0, i)),          # p^T
                pl.BlockSpec((key_dim, tile_b), lambda i: (0, i)),        # k^T
                pl.BlockSpec((hid, plain), lambda i: (0, 0)),             # w_in_p^T
                pl.BlockSpec((hid, key_dim), lambda i: (0, 0)),           # w_in_k^T
                pl.BlockSpec((hid, 1), lambda i: (0, 0)),                 # b_in^T
                pl.BlockSpec((n_res, hid, hid), lambda i: (0, 0, 0)),     # w_mlp^T
                pl.BlockSpec((n_res, hid, 1), lambda i: (0, 0, 0)),       # b_mlp^T
                pl.BlockSpec((cip, hid), lambda i: (0, 0)),               # w_out^T
                pl.BlockSpec((cip, 1), lambda i: (0, 0)),                 # b_out^T
            ],
            out_specs=pl.BlockSpec((cip, tile_b), lambda i: (0, i)),
        ),
        compiler_params=pltpu.CompilerParams(
            dimension_semantics=("parallel",),        # megacore sharding on v7x
            vmem_limit_bytes=32 * 1024 * 1024),       # explicit (v5e default 16 MiB)
    )(pT, kT, packed["w_in_pT"], packed["w_in_kT"], packed["b_inT"],
      packed["w_mlpT"], packed["b_mlpT"], packed["w_outT"], packed["b_outT"])
    return outT.T


def _pick_tile_b(B):
    """Largest lane-multiple tile <= MAX_TILE_B that divides B and gives >= 2
    grid steps (prefer >= 4). Returns 0 if no such tile exists."""
    for denom in (4, 2):
        cap = min(MAX_TILE_B, B // denom)
        tile = (cap // LANE) * LANE
        while tile >= LANE and B % tile != 0:
            tile -= LANE
        if tile >= LANE and B // tile >= 2:
            return tile
    return 0


def alice_forward(p, k, packed_params, *, matmul_dtype=jnp.float32):
    """p: [B, PLAIN], k: [B, KEY] -> [B, CIPHER]."""
    B = p.shape[0]

    if B < THROUGHPUT_MIN_B:
        # latency path: single grid step, no extra wrapper ops at all
        return _alice_latency(p, k, packed_params, matmul_dtype)

    tile_b = _pick_tile_b(B)
    if tile_b == 0:
        # ragged batch: pad to a multiple of 2*LANE, run throughput path, slice rows
        b_pad = ((B + 2 * LANE - 1) // (2 * LANE)) * (2 * LANE)
        p_pad = jnp.zeros((b_pad, p.shape[1]), p.dtype).at[:B].set(p)
        k_pad = jnp.zeros((b_pad, k.shape[1]), k.dtype).at[:B].set(k)
        out = _alice_throughput(p_pad, k_pad, packed_params,
                                _pick_tile_b(b_pad), matmul_dtype)
        return out[:B]

    return _alice_throughput(p, k, packed_params, tile_b, matmul_dtype)


# ----------------------------- param init ------------------------------------
def init_params(key):
    """PyTorch nn.Linear-style init: U(-1/sqrt(fan_in), 1/sqrt(fan_in))."""
    def linear(key, fan_in, fan_out):
        kw, kb = jax.random.split(key)
        bound = 1.0 / jnp.sqrt(fan_in)
        w = jax.random.uniform(kw, (fan_in, fan_out), jnp.float32, -bound, bound)
        b = jax.random.uniform(kb, (1, fan_out), jnp.float32, -bound, bound)
        return w, b

    keys = jax.random.split(key, DEPTH + 1)
    w_in, b_in = linear(keys[0], PLAIN + KEY, HIDDEN)

    w_mlp_list, b_mlp_list = [], []
    for l in range(DEPTH - 1):
        w, b = linear(keys[1 + l], HIDDEN, HIDDEN)
        w_mlp_list.append(w)
        b_mlp_list.append(b)
    w_mlp = jnp.stack(w_mlp_list, axis=0)                 # (DEPTH-1, HIDDEN, HIDDEN)
    b_mlp = jnp.stack(b_mlp_list, axis=0)                 # (DEPTH-1, 1, HIDDEN)

    w_out, b_out = linear(keys[DEPTH], HIDDEN, CIPHER)
    return (w_in, b_in, w_mlp, b_mlp, w_out, b_out)


# ----------------------------- reference -------------------------------------
def alice_reference(p, k, params):
    w_in, b_in, w_mlp, b_mlp, w_out, b_out = params
    x = jnp.concatenate([p, k], axis=-1)
    h = jax.nn.relu(x @ w_in + b_in)
    for l in range(w_mlp.shape[0]):
        h = jax.nn.relu(h + (h @ w_mlp[l] + b_mlp[l]))
    return jnp.tanh(h @ w_out + b_out)


# ----------------------------- main -------------------------------------------
if __name__ == "__main__":
    root = jax.random.PRNGKey(0)
    kp, kk, kparam, kp2, kk2 = jax.random.split(root, 5)

    params = init_params(kparam)
    packed = prepare_params(params)    # one-time split / transpose of weights

    # --- latency path: B=16, single grid step, direct (B, CIPHER) output -----
    p_small = jax.random.uniform(kp, (BATCH, PLAIN), jnp.float32, -1.0, 1.0)
    k_small = jax.random.uniform(kk, (BATCH, KEY), jnp.float32, -1.0, 1.0)
    out_small = jax.block_until_ready(alice_forward(p_small, k_small, packed))
    ref_small = alice_reference(p_small, k_small, params)
    assert out_small.shape == (BATCH, CIPHER)
    assert jnp.allclose(out_small, ref_small, atol=1e-5, rtol=1e-5), (
        f"latency path max abs err {jnp.max(jnp.abs(out_small - ref_small))}")

    # --- throughput path: batch-on-lanes transposed layout, grid >= 2 --------
    B_BIG = 512
    p_big = jax.random.uniform(kp2, (B_BIG, PLAIN), jnp.float32, -1.0, 1.0)
    k_big = jax.random.uniform(kk2, (B_BIG, KEY), jnp.float32, -1.0, 1.0)
    out_big = jax.block_until_ready(alice_forward(p_big, k_big, packed))
    ref_big = alice_reference(p_big, k_big, params)
    assert out_big.shape == (B_BIG, CIPHER)
    assert jnp.allclose(out_big, ref_big, atol=1e-4, rtol=1e-4), (
        f"throughput path max abs err {jnp.max(jnp.abs(out_big - ref_big))}")

    # --- bf16 matmul operands (f32 accumulation); tolerance loosened on purpose
    out_bf16 = jax.block_until_ready(
        alice_forward(p_big, k_big, packed, matmul_dtype=jnp.bfloat16))
    assert jnp.allclose(out_bf16, ref_big, atol=5e-2, rtol=5e-2), (
        f"bf16 path max abs err {jnp.max(jnp.abs(out_bf16 - ref_big))}")

    print("KERNEL_OK")
</pallas_src>

<mosaic_0001>
module attributes {stable_mosaic.version = 11 : i64} {
  func.func @alice_latency_kernel(%arg0: i32, %arg1: memref<16x16xf32, #tpu.memory_space<vmem>>, %arg2: memref<16x16xf32, #tpu.memory_space<vmem>>, %arg3: memref<16x32xf32, #tpu.memory_space<vmem>>, %arg4: memref<16x32xf32, #tpu.memory_space<vmem>>, %arg5: memref<1x32xf32, #tpu.memory_space<vmem>>, %arg6: memref<2x32x32xf32, #tpu.memory_space<vmem>>, %arg7: memref<2x1x32xf32, #tpu.memory_space<vmem>>, %arg8: memref<32x16xf32, #tpu.memory_space<vmem>>, %arg9: memref<1x16xf32, #tpu.memory_space<vmem>>, %arg10: memref<16x16xf32, #tpu.memory_space<vmem>>) attributes {dimension_semantics = [#tpu.dimension_semantics<parallel>], iteration_bounds = array<i64: 1>, scalar_prefetch = 0 : i64, scratch_operands = 0 : i64, tpu.core_type = #tpu.core_type<tc>, window_params = [{pipeline_mode = #tpu.pipeline_mode<synchronous>, transform_indices = @transform_0, window_bounds = array<i64: 16, 16>}, {pipeline_mode = #tpu.pipeline_mode<synchronous>, transform_indices = @transform_1, window_bounds = array<i64: 16, 16>}, {pipeline_mode = #tpu.pipeline_mode<synchronous>, transform_indices = @transform_2, window_bounds = array<i64: 16, 32>}, {pipeline_mode = #tpu.pipeline_mode<synchronous>, transform_indices = @transform_3, window_bounds = array<i64: 16, 32>}, {pipeline_mode = #tpu.pipeline_mode<synchronous>, transform_indices = @transform_4, window_bounds = array<i64: 1, 32>}, {pipeline_mode = #tpu.pipeline_mode<synchronous>, transform_indices = @transform_5, window_bounds = array<i64: 2, 32, 32>}, {pipeline_mode = #tpu.pipeline_mode<synchronous>, transform_indices = @transform_6, window_bounds = array<i64: 2, 1, 32>}, {pipeline_mode = #tpu.pipeline_mode<synchronous>, transform_indices = @transform_7, window_bounds = array<i64: 32, 16>}, {pipeline_mode = #tpu.pipeline_mode<synchronous>, transform_indices = @transform_8, window_bounds = array<i64: 1, 16>}, {pipeline_mode = #tpu.pipeline_mode<synchronous>, transform_indices = @transform_9, window_bounds = array<i64: 16, 16>}]} {
    %c0 = arith.constant 0 : index
    %c0_0 = arith.constant 0 : index
    %0 = vector.load %arg1[%c0, %c0_0] : memref<16x16xf32, #tpu.memory_space<vmem>>, vector<16x16xf32>
    %c0_1 = arith.constant 0 : index
    %c0_2 = arith.constant 0 : index
    %1 = vector.load %arg3[%c0_1, %c0_2] : memref<16x32xf32, #tpu.memory_space<vmem>>, vector<16x32xf32>
    %cst = arith.constant dense<0.000000e+00> : vector<16x32xf32>
    %2 = tpu.matmul %0, %1, %cst {dimension_numbers = #tpu.dot_dimension_numbers<[1], [0], [0], [1], [0, 0, 1, 1], [], []>} : vector<16x16xf32>, vector<16x32xf32>, vector<16x32xf32> -> vector<16x32xf32>
    %c0_3 = arith.constant 0 : index
    %c0_4 = arith.constant 0 : index
    %3 = vector.load %arg2[%c0_3, %c0_4] : memref<16x16xf32, #tpu.memory_space<vmem>>, vector<16x16xf32>
    %c0_5 = arith.constant 0 : index
    %c0_6 = arith.constant 0 : index
    %4 = vector.load %arg4[%c0_5, %c0_6] : memref<16x32xf32, #tpu.memory_space<vmem>>, vector<16x32xf32>
    %cst_7 = arith.constant dense<0.000000e+00> : vector<16x32xf32>
    %5 = tpu.matmul %3, %4, %cst_7 {dimension_numbers = #tpu.dot_dimension_numbers<[1], [0], [0], [1], [0, 0, 1, 1], [], []>} : vector<16x16xf32>, vector<16x32xf32>, vector<16x32xf32> -> vector<16x32xf32>
    %6 = arith.addf %2, %5 : vector<16x32xf32>
    %c0_8 = arith.constant 0 : index
    %c0_9 = arith.constant 0 : index
    %7 = vector.load %arg5[%c0_8, %c0_9] : memref<1x32xf32, #tpu.memory_space<vmem>>, vector<1x32xf32>
    %8 = vector.broadcast %7 : vector<1x32xf32> to vector<16x32xf32>
    %9 = arith.addf %6, %8 : vector<16x32xf32>
    %cst_10 = arith.constant 0.000000e+00 : f32
    %10 = vector.broadcast %cst_10 : f32 to vector<16x32xf32>
    %11 = arith.maximumf %9, %10 : vector<16x32xf32>
    %c0_11 = arith.constant 0 : index
    %c0_12 = arith.constant 0 : index
    %c0_13 = arith.constant 0 : index
    %12 = vector.load %arg6[%c0_11, %c0_12, %c0_13] : memref<2x32x32xf32, #tpu.memory_space<vmem>>, vector<1x32x32xf32>
    %13 = vector.shape_cast %12 : vector<1x32x32xf32> to vector<32x32xf32>
    %cst_14 = arith.constant dense<0.000000e+00> : vector<16x32xf32>
    %14 = tpu.matmul %11, %13, %cst_14 {dimension_numbers = #tpu.dot_dimension_numbers<[1], [0], [0], [1], [0, 0, 1, 1], [], []>} : vector<16x32xf32>, vector<32x32xf32>, vector<16x32xf32> -> vector<16x32xf32>
    %c0_15 = arith.constant 0 : index
    %c0_16 = arith.constant 0 : index
    %c0_17 = arith.constant 0 : index
    %15 = vector.load %arg7[%c0_15, %c0_16, %c0_17] : memref<2x1x32xf32, #tpu.memory_space<vmem>>, vector<1x1x32xf32>
    %16 = vector.shape_cast %15 : vector<1x1x32xf32> to vector<1x32xf32>
    %17 = vector.broadcast %16 : vector<1x32xf32> to vector<16x32xf32>
    %18 = arith.addf %14, %17 : vector<16x32xf32>
    %19 = arith.addf %11, %18 : vector<16x32xf32>
    %cst_18 = arith.constant 0.000000e+00 : f32
    %20 = vector.broadcast %cst_18 : f32 to vector<16x32xf32>
    %21 = arith.maximumf %19, %20 : vector<16x32xf32>
    %c1 = arith.constant 1 : index
    %c0_19 = arith.constant 0 : index
    %c0_20 = arith.constant 0 : index
    %22 = vector.load %arg6[%c1, %c0_19, %c0_20] : memref<2x32x32xf32, #tpu.memory_space<vmem>>, vector<1x32x32xf32>
    %23 = vector.shape_cast %22 : vector<1x32x32xf32> to vector<32x32xf32>
    %cst_21 = arith.constant dense<0.000000e+00> : vector<16x32xf32>
    %24 = tpu.matmul %21, %23, %cst_21 {dimension_numbers = #tpu.dot_dimension_numbers<[1], [0], [0], [1], [0, 0, 1, 1], [], []>} : vector<16x32xf32>, vector<32x32xf32>, vector<16x32xf32> -> vector<16x32xf32>
    %c1_22 = arith.constant 1 : index
    %c0_23 = arith.constant 0 : index
    %c0_24 = arith.constant 0 : index
    %25 = vector.load %arg7[%c1_22, %c0_23, %c0_24] : memref<2x1x32xf32, #tpu.memory_space<vmem>>, vector<1x1x32xf32>
    %26 = vector.shape_cast %25 : vector<1x1x32xf32> to vector<1x32xf32>
    %27 = vector.broadcast %26 : vector<1x32xf32> to vector<16x32xf32>
    %28 = arith.addf %24, %27 : vector<16x32xf32>
    %29 = arith.addf %21, %28 : vector<16x32xf32>
    %cst_25 = arith.constant 0.000000e+00 : f32
    %30 = vector.broadcast %cst_25 : f32 to vector<16x32xf32>
    %31 = arith.maximumf %29, %30 : vector<16x32xf32>
    %c0_26 = arith.constant 0 : index
    %c0_27 = arith.constant 0 : index
    %32 = vector.load %arg8[%c0_26, %c0_27] : memref<32x16xf32, #tpu.memory_space<vmem>>, vector<32x16xf32>
    %cst_28 = arith.constant dense<0.000000e+00> : vector<16x16xf32>
    %33 = tpu.matmul %31, %32, %cst_28 {dimension_numbers = #tpu.dot_dimension_numbers<[1], [0], [0], [1], [0, 0, 1, 1], [], []>} : vector<16x32xf32>, vector<32x16xf32>, vector<16x16xf32> -> vector<16x16xf32>
    %c0_29 = arith.constant 0 : index
    %c0_30 = arith.constant 0 : index
    %34 = vector.load %arg9[%c0_29, %c0_30] : memref<1x16xf32, #tpu.memory_space<vmem>>, vector<1x16xf32>
    %35 = vector.broadcast %34 : vector<1x16xf32> to vector<16x16xf32>
    %36 = arith.addf %33, %35 : vector<16x16xf32>
    %37 = math.tanh %36 : vector<16x16xf32>
    %c0_31 = arith.constant 0 : index
    %c0_32 = arith.constant 0 : index
    %38 = vector.load %arg10[%c0_31, %c0_32] : memref<16x16xf32, #tpu.memory_space<vmem>>, vector<16x16xf32>
    tpu.vector_store %arg10[%c0_31, %c0_32], %37 {strides = array<i32>} : memref<16x16xf32, #tpu.memory_space<vmem>>, vector<16x16xf32>,
    return
  }
  func.func @transform_0(%arg0: i32) -> (i32, i32) {
    %c0_i32 = arith.constant 0 : i32
    %c0_i32_0 = arith.constant 0 : i32
    %c0_i32_1 = arith.constant 0 : i32
    return %c0_i32, %c0_i32_0 : i32, i32
  }
  func.func @transform_1(%arg0: i32) -> (i32, i32) {
    %c0_i32 = arith.constant 0 : i32
    %c0_i32_0 = arith.constant 0 : i32
    %c0_i32_1 = arith.constant 0 : i32
    return %c0_i32, %c0_i32_0 : i32, i32
  }
  func.func @transform_2(%arg0: i32) -> (i32, i32) {
    %c0_i32 = arith.constant 0 : i32
    %c0_i32_0 = arith.constant 0 : i32
    %c0_i32_1 = arith.constant 0 : i32
    return %c0_i32, %c0_i32_0 : i32, i32
  }
  func.func @transform_3(%arg0: i32) -> (i32, i32) {
    %c0_i32 = arith.constant 0 : i32
    %c0_i32_0 = arith.constant 0 : i32
    %c0_i32_1 = arith.constant 0 : i32
    return %c0_i32, %c0_i32_0 : i32, i32
  }
  func.func @transform_4(%arg0: i32) -> (i32, i32) {
    %c0_i32 = arith.constant 0 : i32
    %c0_i32_0 = arith.constant 0 : i32
    %c0_i32_1 = arith.constant 0 : i32
    return %c0_i32, %c0_i32_0 : i32, i32
  }
  func.func @transform_5(%arg0: i32) -> (i32, i32, i32) {
    %c0_i32 = arith.constant 0 : i32
    %c0_i32_0 = arith.constant 0 : i32
    %c0_i32_1 = arith.constant 0 : i32
    %c0_i32_2 = arith.constant 0 : i32
    return %c0_i32, %c0_i32_0, %c0_i32_1 : i32, i32, i32
  }
  func.func @transform_6(%arg0: i32) -> (i32, i32, i32) {
    %c0_i32 = arith.constant 0 : i32
    %c0_i32_0 = arith.constant 0 : i32
    %c0_i32_1 = arith.constant 0 : i32
    %c0_i32_2 = arith.constant 0 : i32
    return %c0_i32, %c0_i32_0, %c0_i32_1 : i32, i32, i32
  }
  func.func @transform_7(%arg0: i32) -> (i32, i32) {
    %c0_i32 = arith.constant 0 : i32
    %c0_i32_0 = arith.constant 0 : i32
    %c0_i32_1 = arith.constant 0 : i32
    return %c0_i32, %c0_i32_0 : i32, i32
  }
  func.func @transform_8(%arg0: i32) -> (i32, i32) {
    %c0_i32 = arith.constant 0 : i32
    %c0_i32_0 = arith.constant 0 : i32
    %c0_i32_1 = arith.constant 0 : i32
    return %c0_i32, %c0_i32_0 : i32, i32
  }
  func.func @transform_9(%arg0: i32) -> (i32, i32) {
    %c0_i32 = arith.constant 0 : i32
    %c0_i32_0 = arith.constant 0 : i32
    %c0_i32_1 = arith.constant 0 : i32
    return %c0_i32, %c0_i32_0 : i32, i32
  }
}

</mosaic_0001>

<bundles_post_ra>
// kernel: tpu_custom_call.1
= control target key start
LH: loop header
LB: loop body
LE: loop exit
PB: predicated region body
PF: predicated region fallthrough
CT: control target
= control target key end

     0   :  { %14 = vsyncpa [#allocation3], 0  ;;  %s1085_s0 = inlined_call_operand.hbm [shape: f32[16,16], index: 0, kind: input, shape index: {}]   ;;  %s1086_s1 = inlined_call_operand.hbm [shape: f32[16,16], index: 1, kind: input, shape index: {}]   ;;  %s1087_s2 = inlined_call_operand.hbm [shape: f32[16,32], index: 2, kind: input, shape index: {}]   ;;  %s1088_s3 = inlined_call_operand.hbm [shape: f32[16,32], index: 3, kind: input, shape index: {}]   ;;  %s1089_s4 = inlined_call_operand.hbm [shape: f32[1,32], index: 4, kind: input, shape index: {}]   ;;  %s1090_s5 = inlined_call_operand.vmem [shape: f32[2,32,32], index: 5, kind: input, shape index: {}]   ;;  %s1091_s6 = inlined_call_operand.vmem [shape: f32[2,1,32], index: 6, kind: input, shape index: {}]   ;;  %s1092_s7 = inlined_call_operand.vmem [shape: f32[32,16], index: 7, kind: input, shape index: {}]   ;;  %s1093_s8 = inlined_call_operand.vmem [shape: f32[1,16], index: 8, kind: input, shape index: {}]   ;;  %s1094_s9 = inlined_call_operand.hbm [shape: f32[16,16], index: 9, kind: output, shape index: {}]  }
   0x1   :  { %15 = vsyncpa [#allocation6], 0 }
   0x2   :  { %16 = vsyncpa [#allocation9], 0 }
   0x3   :  { %17 = vsyncpa [#allocation4], 0  ;;  %s869_s30 = smov [#allocation5]   ;;  %s870_s11 = smov [#allocation8]  }
   0x4   :  { %s35_s10 = sshll.u32 %s869_s30, 4  ;;  %s59_s12 = sshll.u32 %s870_s11, 4  ;;  %s36_s10 = int_to_ptr.vmem [resolvable:$true] %s35_s10  ;;  %s927_s12 = int_to_ptr.vmem [resolvable:$true] %s59_s12 }
   0x5   :  { %s729_s15 = scalar_lea.hbm %s1086_s1, 256 }
   0x6   :  { %p730_p0 = scmp.ne.s32.totalorder %s1086_s1, %s729_s15  ;;  %p733_p1 = scmp.lt.u32.totalorder %s729_s15, %s1086_s1 }
   0x8   :  { %p735_p2 = pnand %p733_p1, %p730_p0 }
   0xa   :  { %738 = shalt.err (!%p735_p2)
}
   0xb   :  { %s739_s20 = scalar_lea.vmem %s36_s10, 256  ;;  %p744_p4 = scmp.lt.s32.totalorder %s36_s10, %s36_s10 }
   0xc   :  { %p740_p3 = scmp.ne.s32.totalorder %s36_s10, %s739_s20  ;;  %p745_p5 = scmp.lt.s32.totalorder %s739_s20, %s739_s20 }
   0xe   :  { %p746_p6 = por %p745_p5, %p744_p4 }
  0x10   :  { %p747_p7 = pnand %p746_p6, %p740_p3 }
  0x12   :  { %750 = shalt.err (!%p747_p7)
}
  0x13   :  { %s871_s21 = smov 128   ;;  %s872_s22 = smov 8  }
  0x14   :  { %41 = dma.hbm_to_vmem [thread:$0]  %s1086_s1, 256, %s36_s10, [#allocation6], %s871_s21, %s871_s21, %s872_s22  }
  0x15   :  { %s751_s27 = scalar_lea.hbm %s1088_s3, 256 }
  0x16   :  { %p752_p8 = scmp.ne.s32.totalorder %s1088_s3, %s751_s27  ;;  %p755_p9 = scmp.lt.u32.totalorder %s751_s27, %s1088_s3 }
  0x18   :  { %p757_p10 = pnand %p755_p9, %p752_p8 }
  0x1a   :  { %760 = shalt.err (!%p757_p10)
}
  0x1b   :  { %s761_s13 = scalar_lea.vmem %s927_s12, 256  ;;  %p766_p12 = scmp.lt.s32.totalorder %s927_s12, %s927_s12 }
  0x1c   :  { %p762_p11 = scmp.ne.s32.totalorder %s927_s12, %s761_s13  ;;  %p767_p13 = scmp.lt.s32.totalorder %s761_s13, %s761_s13 }
  0x1e   :  { %p768_p0 = por %p767_p13, %p766_p12 }
  0x20   :  { %p769_p1 = pnand %p768_p0, %p762_p11 }
  0x22   :  { %772 = shalt.err (!%p769_p1)
}
  0x23   :  { %65 = dma.hbm_to_vmem [thread:$0]  %s1088_s3, 256, %s927_s12, [#allocation9], %s871_s21, %s871_s21, %s872_s22  }
  0x24   :  { %s873_s14 = smov [#allocation2]   ;;  %s874_s16 = smov [#allocation7]  }
  0x25   :  { %s23_s15 = sshll.u32 %s873_s14, 4  ;;  %s47_s17 = sshll.u32 %s874_s16, 4  ;;  %s24_s15 = int_to_ptr.vmem [resolvable:$true] %s23_s15  ;;  %s964_s17 = int_to_ptr.vmem [resolvable:$true] %s47_s17 }
  0x26   :  { %s773_s20 = scalar_lea.hbm %s1085_s0, 256 }
  0x27   :  { %p774_p2 = scmp.ne.s32.totalorder %s1085_s0, %s773_s20  ;;  %p777_p3 = scmp.lt.u32.totalorder %s773_s20, %s1085_s0 }
  0x29   :  { %p779_p4 = pnand %p777_p3, %p774_p2 }
  0x2b   :  { %782 = shalt.err (!%p779_p4)
}
  0x2c   :  { %s783_s3 = scalar_lea.vmem %s24_s15, 256  ;;  %p788_p6 = scmp.lt.s32.totalorder %s24_s15, %s24_s15 }
  0x2d   :  { %p784_p5 = scmp.ne.s32.totalorder %s24_s15, %s783_s3  ;;  %p789_p7 = scmp.lt.s32.totalorder %s783_s3, %s783_s3 }
  0x2f   :  { %p790_p8 = por %p789_p7, %p788_p6 }
  0x31   :  { %p791_p9 = pnand %p790_p8, %p784_p5 }
  0x33   :  { %794 = shalt.err (!%p791_p9)
}
  0x34   :  { %29 = dma.hbm_to_vmem [thread:$0]  %s1085_s0, 256, %s24_s15, [#allocation3], %s871_s21, %s871_s21, %s872_s22  }
  0x35   :  { %s795_s30 = scalar_lea.hbm %s1087_s2, 256 }
  0x36   :  { %p796_p10 = scmp.ne.s32.totalorder %s1087_s2, %s795_s30  ;;  %p799_p11 = scmp.lt.u32.totalorder %s795_s30, %s1087_s2 }
  0x38   :  { %p801_p12 = pnand %p799_p11, %p796_p10 }
  0x3a   :  { %804 = shalt.err (!%p801_p12)
}
  0x3b   :  { %s805_s14 = scalar_lea.vmem %s964_s17, 256  ;;  %p810_p0 = scmp.lt.s32.totalorder %s964_s17, %s964_s17 }
  0x3c   :  { %p806_p13 = scmp.ne.s32.totalorder %s964_s17, %s805_s14  ;;  %p811_p1 = scmp.lt.s32.totalorder %s805_s14, %s805_s14 }
  0x3e   :  { %p812_p2 = por %p811_p1, %p810_p0 }
  0x40   :  { %p813_p3 = pnand %p812_p2, %p806_p13 }
  0x42   :  { %816 = shalt.err (!%p813_p3)
}
  0x43   :  { %53 = dma.hbm_to_vmem [thread:$0]  %s1087_s2, 256, %s964_s17, [#allocation6], %s871_s21, %s871_s21, %s872_s22  }
  0x44   :  { %s875_s16 = smov [#allocation10]   ;;  %s817_s23 = scalar_lea.hbm %s1089_s4, 16 }
  0x45   :  { %s72_s18 = sshll.u32 %s875_s16, 4  ;;  %p818_p4 = scmp.ne.s32.totalorder %s1089_s4, %s817_s23  ;;  %s73_s18 = int_to_ptr.vmem [resolvable:$true] %s72_s18 }
  0x46   :  { %p821_p5 = scmp.lt.u32.totalorder %s817_s23, %s1089_s4 }
  0x48   :  { %p823_p6 = pnand %p821_p5, %p818_p4 }
  0x4a   :  { %826 = shalt.err (!%p823_p6)
}
  0x4b   :  { %s827_s12 = scalar_lea.vmem %s73_s18, 16  ;;  %s831_s2 = scalar_lea.vmem %s73_s18, 32 }
  0x4c   :  { %p828_p7 = scmp.ne.s32.totalorder %s73_s18, %s827_s12  ;;  %p832_p8 = scmp.lt.s32.totalorder %s73_s18, %s73_s18 }
  0x4d   :  { %p833_p9 = scmp.lt.s32.totalorder %s831_s2, %s827_s12 }
  0x4f   :  { %p834_p10 = por %p833_p9, %p832_p8 }
  0x51   :  { %p835_p11 = pnand %p834_p10, %p828_p7 }
  0x53   :  { %838 = shalt.err (!%p835_p11)
}
  0x54   :  { %75 = dma.hbm_to_vmem [thread:$0]  %s1089_s4, 16, %s73_s18, [#allocation9]  }
  0x55   :  { %861 = dma.done.wait [#allocation3], 256  }
  0x56   :  { %862 = vsyncadd [#allocation3], 4294967040 }
  0x57   :  { %863 = dma.done.wait [#allocation6], 512  }
  0x58   :  { %864 = vsyncadd [#allocation6], 4294966784 }
  0x59   :  { %865 = dma.done.wait [#allocation9], 272  }
  0x5a   :  { %866 = vsyncadd [#allocation9], 4294967024  ;;  %vm107_vm0 = vcmask 130048   ;;  %v105_v0 = vld [vmem:[#allocation8] sm:$0xff]  ;;  %v106_v1 = vld [vmem:[#allocation8 + $0x8] sm:$0xff]  ;;  %vm292_vm1 = vcmask 261120  }
  0x5b   :  { %v103_v2 = vld [vmem:[#allocation5] sm:$0xff]  ;;  %v683_v3 = vpack.c.bf16 %v106_v1, %v105_v0  ;;  %v101_v4 = vld [vmem:[#allocation7] sm:$0xff]  ;;  %v102_v5 = vld [vmem:[#allocation7 + $0x8] sm:$0xff] }
  0x5c   :  { %640 = vmatprep.mubr.msk.f32.mxu0 %vm107_vm0, %v103_v2  ;;  %v687_v6 = vpack.c.bf16 %v102_v5, %v101_v4  ;;  %v281_v7 = vld [vmem:[%s1090_s5] sm:$0xff]  ;;  %v282_v8 = vld [vmem:[%s1090_s5 + $0x8] sm:$0xff]  ;;  %v104_v9 = vld [vmem:[#allocation5 + $0x8] sm:$0xff] }
  0x5d   :  { %684 = vmatprep.subr.bf16.mxu0 %v683_v3  ;;  %v691_v10 = vpack.c.bf16 %v282_v8, %v281_v7  ;;  %v99_v11 = vld [vmem:[#allocation2] sm:$0xff]  ;;  %v100_v12 = vld [vmem:[#allocation2 + $0x8] sm:$0xff]  ;;  %v283_v13 = vld [vmem:[%s1090_s5 + $0x10] sm:$0xff] }
  0x5e   :  { %686 = vmatpush3.bf16.msra.mxu0 %v683_v3  ;;  %v284_v14 = vld [vmem:[%s1090_s5 + $0x18] sm:$0xff]  ;;  %v595_v16 = vld [vmem:[#allocation10] ss:$0 sm:$0xff]  ;;  %v600_v24 = vld [vmem:[%s1090_s5 + $0x28] sm:$0xff] }
  0x5f   :  { %688 = vmatprep.subr.bf16.mxu0 %v687_v6  ;;  %692 = vmatprep.subr.bf16.mxu1 %v691_v10  ;;  %v695_v15 = vpack.c.bf16 %v284_v14, %v283_v13  ;;  %v599_v23 = vld [vmem:[%s1090_s5 + $0x20] sm:$0xff]  ;;  %v601_v26 = vld [vmem:[%s1090_s5 + $0x30] sm:$0xff]  ;;  %v602_v27 = vld [vmem:[%s1090_s5 + $0x38] sm:$0xff] }
  0x60   :  { %694 = vmatpush3.bf16.msra.mxu1 %v691_v10  ;;  %v699_v25 = vpack.c.bf16 %v600_v24, %v599_v23  ;;  %v703_v28 = vpack.c.bf16 %v602_v27, %v601_v26  ;;  %v596_v29 = vld [vmem:[%s1091_s6] ss:$0 sm:$0xff]  ;;  %v477_v39 = vld [vmem:[%s1092_s7 + $0x8] sm:$0xff]  ;;  %v478_v41 = vld [vmem:[%s1092_s7 + $0x10] sm:$0xff] }
  0x61   :  { %641 = vmatmul.mubr.msk.f32.vlgmr.msra.gmra.mrb[0].mxu0 %vm107_vm0, %v104_v9  ;;  %696 = vmatprep.subr.bf16.mxu1 %v695_v15  ;;  %v476_v38 = vld [vmem:[%s1092_s7] sm:$0xff]  ;;  %v479_v42 = vld [vmem:[%s1092_s7 + $0x18] sm:$0xff] }
  0x62   :  { %690 = vmatpush3.bf16.msra.mxu0 %v687_v6  ;;  %647 = vmatprep.mubr.msk.f32.mxu0 %vm107_vm0, %v99_v11  ;;  %v707_v40 = vpack.c.bf16 %v477_v39, %v476_v38  ;;  %v711_v43 = vpack.c.bf16 %v479_v42, %v478_v41  ;;  %v604_v44 = vld [vmem:[%s1091_s6 + $0x1] ss:$0 sm:$0xff]  ;;  %v607_v53 = vld [vmem:[%s1093_s8] ss:$0 sm:$0xff]  ;;  %s876_s6 = smov [#allocation11]  }
  0x63   :  { %700 = vmatprep.subr.bf16.mxu0 %v699_v25  ;;  %s577_s11 = sshll.u32 %s876_s6, 4  ;;  %s578_s11 = int_to_ptr.vmem [resolvable:$true] %s577_s11 }
  0x64   :  { %698 = vmatpush3.bf16.msra.mxu1 %v695_v15  ;;  %s839_s13 = scalar_lea.vmem %s578_s11, 256  ;;  %p844_p13 = scmp.lt.s32.totalorder %s578_s11, %s578_s11 }
  0x65   :  { %708 = vmatprep.subr.bf16.mxu1 %v707_v40  ;;  %p840_p12 = scmp.ne.s32.totalorder %s578_s11, %s839_s13  ;;  %p845_p0 = scmp.lt.s32.totalorder %s839_s13, %s839_s13 }
  0x67   :  { %p846_p1 = por %p845_p0, %p844_p13 }
  0x69   :  { %648 = vmatmul.mubr.msk.f32.vlgmr.msra.gmra.mrb[0].mxu0 %vm107_vm0, %v100_v12  ;;  %p847_p2 = pnand %p846_p1, %p840_p12 }
  0x6a   :  { %702 = vmatpush3.bf16.msra.mxu0 %v699_v25 }
  0x6b   :  { %704 = vmatprep.subr.bf16.mxu0 %v703_v28 }
  0x6e   :  { %706 = vmatpush3.bf16.msra.mxu0 %v703_v28 }
 0x13c   :  { %v649_v17 = vpop.f32.mrb[0].mxu0 }
 0x13d   :  { %v278_v18 = vadd.f32 %v649_v17, %v595_v16  ;;  %v261_v19 = vpop.f32.mrb[1].mxu0 }
 0x13e   :  { %v277_v20 = vadd.f32 %v595_v16, %v261_v19 }
 0x13f   :  { %v280_v22 = vmax.f32 %v278_v18, 0.0 }
 0x140   :  { %v279_v21 = vmax.f32 %v277_v20, 0.0 }
 0x142   :  { %658 = vmatprep.mubr.msk.f32.mxu1 %vm292_vm1, %v279_v21 }
 0x143   :  { %659 = vmatmul.mubr.msk.f32.vlgmr.msra.gmra.mrb[0].mxu1 %vm292_vm1, %v280_v22 }
 0x144   :  { %710 = vmatpush3.bf16.msra.mxu1 %v707_v40 }
 0x145   :  { %712 = vmatprep.subr.bf16.mxu1 %v711_v43 }
 0x148   :  { %714 = vmatpush3.bf16.msra.mxu1 %v711_v43 }
 0x216   :  { %v660_v30 = vpop.f32.mrb[0].mxu1 }
 0x217   :  { %v371_v31 = vadd.f32 %v660_v30, %v596_v29  ;;  %v365_v32 = vpop.f32.mrb[1].mxu1 }
 0x218   :  { %v366_v33 = vadd.f32 %v596_v29, %v365_v32 }
 0x219   :  { %v375_v34 = vadd.f32 %v371_v31, %v280_v22 }
 0x21a   :  { %v374_v35 = vadd.f32 %v366_v33, %v279_v21 }
 0x21b   :  { %v377_v37 = vmax.f32 %v375_v34, 0.0 }
 0x21c   :  { %v376_v36 = vmax.f32 %v374_v35, 0.0 }
 0x21e   :  { %669 = vmatprep.mubr.msk.f32.mxu0 %vm292_vm1, %v376_v36 }
 0x21f   :  { %670 = vmatmul.mubr.msk.f32.vlgmr.msra.gmra.mrb[2].mxu0 %vm292_vm1, %v377_v37 }
 0x2f2   :  { %v671_v45 = vpop.f32.mrb[2].mxu0 }
 0x2f3   :  { %v469_v46 = vadd.f32 %v671_v45, %v604_v44  ;;  %v463_v47 = vpop.f32.mrb[3].mxu0 }
 0x2f4   :  { %v464_v48 = vadd.f32 %v604_v44, %v463_v47 }
 0x2f5   :  { %v473_v49 = vadd.f32 %v469_v46, %v377_v37 }
 0x2f6   :  { %v472_v50 = vadd.f32 %v464_v48, %v376_v36 }
 0x2f7   :  { %v475_v52 = vmax.f32 %v473_v49, 0.0 }
 0x2f8   :  { %v474_v51 = vmax.f32 %v472_v50, 0.0 }
 0x2fa   :  { %680 = vmatprep.mubr.msk.f32.mxu1 %vm292_vm1, %v474_v51 }
 0x2fb   :  { %681 = vmatmul.mubr.msk.f32.vlgmr.msra.gmra.mrb[2].mxu1 %vm292_vm1, %v475_v52 }
 0x3ce   :  { %v682_v54 = vpop.f32.mrb[2].mxu1 }
 0x3cf   :  { %v565_v55 = vadd.f32 %v682_v54, %v607_v53  ;;  %v559_v56 = vpop.f32.mrb[3].mxu1 }
 0x3d0   :  { %v560_v57 = vadd.f32 %v607_v53, %v559_v56 }
 0x3d1   :  { %725 = vtanh.f32 %v565_v55 }
 0x3d2   :  { %727 = vtanh.f32 %v560_v57 }
 0x3db   :  { %v726_v58 = vpop.eup %725 }
 0x3dc   :  { %v728_v59 = vpop.eup %727  ;;  %571 = vst.msk [vmem:[#allocation11 + $0x8] sm:$0xff] %vm107_vm0, %v726_v58 }
 0x3dd   :  { %570 = vst.msk [vmem:[#allocation11] sm:$0xff] %vm107_vm0, %v728_v59 }
 0x3de   :  { %850 = shalt.err (!%p847_p2)
}
 0x3df   :  { %s851_s10 = scalar_lea.hbm %s1094_s9, 256 }
 0x3e0   :  { %p852_p3 = scmp.ne.s32.totalorder %s1094_s9, %s851_s10  ;;  %p855_p4 = scmp.lt.u32.totalorder %s851_s10, %s1094_s9 }
 0x3e2   :  { %p857_p5 = pnand %p855_p4, %p852_p3 }
 0x3e4   :  { %860 = shalt.err (!%p857_p5)
}
 0x3e5   :  { %583 = dma.vmem_to_hbm [thread:$0]  %s578_s11, 256, %s1094_s9, [#allocation4], %s871_s21, %s871_s21, %s872_s22  }
 0x3e6   :  { %867 = dma.done.wait [#allocation4], 256  }
 0x3e7   :  { %868 = vsyncadd [#allocation4], 4294967040 }
 0x3e8   :  { %587 = vsyncpa [#allocation3], 1 }
 0x3e9   :  { %588 = vsyncpa [#allocation6], 1 }
 0x3ea   :  { %589 = vsyncpa [#allocation9], 1 }
 0x3eb   :  { %590 = vsyncpa [#allocation4], 1 }

</bundles_post_ra>
